<compile_context>
chip_gen: v7x
topology: tpu7x:2x2x1
jax: 0.10.0
libtpu: 0.0.40
codegen_flags: <defaults>
</compile_context>

<pallas_src>
import jax
import jax.numpy as jnp
from jax.experimental import pallas as pl
from jax.experimental.pallas import tpu as pltpu

_LANE = 128            # lane width; hidden dim padded to a multiple of this
_SUBLANE = 16          # batch-tile granularity (bf16 sublane packing safe)
_MAX_BATCH_TILE = 2048 # per perf review: step overhead dominated at 512


def _round_up(x, m):
    return ((x + m - 1) // m) * m


def _pad2d(a, rows, cols, dtype):
    """Zero-pad a 2-D array to (rows, cols) and cast (one-time, at prepare)."""
    out = jnp.zeros((rows, cols), dtype)
    return out.at[: a.shape[0], : a.shape[1]].set(a.astype(dtype))


# ------------------------------- kernel --------------------------------------

def _policy_kernel(state_ref, w1_ref, b1_ref, w2_ref, b2_ref, wm_ref, bm_ref,
                   scale_ref, bias_ref, out_ref):
    """One batch tile of the 3-layer MLP.

    state_ref : (TB, num_inputs) float32  (tiled over batch)
    w1_ref    : (num_inputs, H_P) mat dtype   -- resident
    w2_ref    : (H_P, H_P)        mat dtype   -- resident
    wm_ref    : (H_P, A)          mat dtype   -- resident
    b*_ref    : (1, H_P) / (1, A) float32     -- resident
    scale/bias: (1, A) float32                -- resident
    out_ref   : (TB, A) float32
    """
    # Cast to the matmul dtype in-kernel (HBM read stays unpadded f32).
    x = state_ref[...].astype(w1_ref.dtype)

    # linear1 + relu  (MXU matmul, f32 accumulate, f32 elementwise)
    h1 = jnp.dot(x, w1_ref[...], preferred_element_type=jnp.float32)
    h1 = jnp.maximum(h1 + b1_ref[...], 0.0)

    # linear2 + relu
    h2 = jnp.dot(h1.astype(w2_ref.dtype), w2_ref[...],
                 preferred_element_type=jnp.float32)
    h2 = jnp.maximum(h2 + b2_ref[...], 0.0)

    # mean head: tanh(.) * action_scale + action_bias  (EUP tanh in f32)
    m = jnp.dot(h2.astype(wm_ref.dtype), wm_ref[...],
                preferred_element_type=jnp.float32)
    m = jnp.tanh(m + bm_ref[...]) * scale_ref[...] + bias_ref[...]

    out_ref[...] = m.astype(out_ref.dtype)


# ----------------------------- host wrappers ---------------------------------

def prepare_policy_params(params, action_scale=1.0, action_bias=0.0, *,
                          use_bf16=True):
    """One-time padding / casting of weights (hoisted out of the forward path).

    params: (w1, b1, w2, b2, wm, bm) with w*: (in_features, out_features).
    action_scale / action_bias: python scalar or per-action-dim array.
    """
    w1, b1, w2, b2, wm, bm = params
    num_inputs, hidden_dim = w1.shape
    num_actions = wm.shape[1]
    h_p = _round_up(hidden_dim, _LANE)          # hidden padded to lane multiple
    mat_dtype = jnp.bfloat16 if use_bf16 else jnp.float32

    w1_p = _pad2d(w1, num_inputs, h_p, mat_dtype)    # K dim stays unpadded
    w2_p = _pad2d(w2, h_p, h_p, mat_dtype)
    wm_p = _pad2d(wm, h_p, num_actions, mat_dtype)   # action dim stays unpadded
    b1_p = _pad2d(b1.reshape(1, -1), 1, h_p, jnp.float32)
    b2_p = _pad2d(b2.reshape(1, -1), 1, h_p, jnp.float32)
    bm_p = jnp.asarray(bm, jnp.float32).reshape(1, num_actions)

    scale_p = jnp.broadcast_to(
        jnp.asarray(action_scale, jnp.float32).reshape(1, -1),
        (1, num_actions)).astype(jnp.float32)
    bias_p = jnp.broadcast_to(
        jnp.asarray(action_bias, jnp.float32).reshape(1, -1),
        (1, num_actions)).astype(jnp.float32)

    return (w1_p, b1_p, w2_p, b2_p, wm_p, bm_p, scale_p, bias_p)


def _pick_batch_tile(B, num_inputs, h_p, num_actions, max_tile):
    """Largest batch tile (multiple of 16) that keeps the per-step VMEM
    footprint within a conservative budget (fits v7x's 64 MiB/TC VMEM even
    with double-buffered resident weights)."""
    tb = min(max_tile, _round_up(B, _SUBLANE))
    tb = max(_SUBLANE, _round_up(tb, _SUBLANE))
    # Bytes per batch row: state (2x f32 double-buffered + bf16 cast),
    # output (2x f32), h1/h2 f32 + their bf16 matmul-input copies.
    per_row = (2 * num_inputs * 4 + num_inputs * 2
               + 2 * num_actions * 4
               + h_p * (4 + 2) * 2)
    budget = 20 << 20
    while tb > _SUBLANE and tb * per_row > budget:
        tb = _round_up(tb // 2, _SUBLANE)
    return tb


def deterministic_policy_forward(state, prepared, *, block_b=_MAX_BATCH_TILE):
    """state: [B, num_inputs] float32. prepared: output of prepare_policy_params.
    Returns mean: [B, num_actions] float32."""
    w1_p, b1_p, w2_p, b2_p, wm_p, bm_p, scale_p, bias_p = prepared
    B, num_inputs = state.shape
    assert num_inputs == w1_p.shape[0], "state feature dim mismatch"
    h_p = w1_p.shape[1]
    num_actions = wm_p.shape[1]

    tb = _pick_batch_tile(B, num_inputs, h_p, num_actions, block_b)
    grid = (pl.cdiv(B, tb),)   # partial last block handled by Pallas masking

    # Weights / biases: same block every grid step -> stay resident in VMEM.
    # (On v7x with very large hidden dims, single-buffering these via
    #  pipeline_mode would halve their footprint; the tb cap above keeps us
    #  within budget without relying on it.)
    def resident(a):
        return pl.BlockSpec(a.shape, lambda i: (0, 0))

    # Explicit VMEM budget for the compiler (v7x has only 64 MiB/TC).
    bytes_resident = 2 * sum(
        int(a.size) * a.dtype.itemsize
        for a in (w1_p, b1_p, w2_p, b2_p, wm_p, bm_p, scale_p, bias_p))
    bytes_tiles = tb * (2 * num_inputs * 4 + num_inputs * 2
                        + 2 * num_actions * 4 + h_p * 12)
    vmem_limit = int(min(max(2 * (bytes_resident + bytes_tiles), 32 << 20),
                         64 << 20))

    out = pl.pallas_call(
        _policy_kernel,
        out_shape=jax.ShapeDtypeStruct((B, num_actions), jnp.float32),
        grid=grid,
        in_specs=[
            # state: tiled over batch, read unpadded f32 straight from HBM
            pl.BlockSpec((tb, num_inputs), lambda i: (i, 0)),
            resident(w1_p), resident(b1_p),
            resident(w2_p), resident(b2_p),
            resident(wm_p), resident(bm_p),
            resident(scale_p), resident(bias_p),
        ],
        # output: unpadded lane width == num_actions (no 128-lane HBM blowup)
        out_specs=pl.BlockSpec((tb, num_actions), lambda i: (i, 0)),
        compiler_params=pltpu.CompilerParams(
            dimension_semantics=("parallel",),   # megacore split on v7x
            vmem_limit_bytes=vmem_limit),
    )(state, w1_p, b1_p, w2_p, b2_p, wm_p, bm_p, scale_p, bias_p)
    return out


# -------------------------- init + pure-JAX reference ------------------------

def xavier_uniform(key, fan_in, fan_out, gain=1.0):
    # Matches torch.nn.init.xavier_uniform_; built directly in (in, out) layout.
    bound = gain * jnp.sqrt(6.0 / (fan_in + fan_out))
    return jax.random.uniform(key, (fan_in, fan_out), jnp.float32, -bound, bound)


def init_params(key, num_inputs, num_actions, hidden_dim):
    k1, k2, k3, kb1, kb2, kb3 = jax.random.split(key, 6)
    w1 = xavier_uniform(k1, num_inputs, hidden_dim)
    b1 = jax.random.uniform(kb1, (hidden_dim,), jnp.float32,
                            -1.0 / jnp.sqrt(num_inputs), 1.0 / jnp.sqrt(num_inputs))
    w2 = xavier_uniform(k2, hidden_dim, hidden_dim)
    b2 = jax.random.uniform(kb2, (hidden_dim,), jnp.float32,
                            -1.0 / jnp.sqrt(hidden_dim), 1.0 / jnp.sqrt(hidden_dim))
    wm = xavier_uniform(k3, hidden_dim, num_actions)
    bm = jax.random.uniform(kb3, (num_actions,), jnp.float32,
                            -1.0 / jnp.sqrt(hidden_dim), 1.0 / jnp.sqrt(hidden_dim))
    return (w1, b1, w2, b2, wm, bm)


def reference_forward(state, params, action_scale=1.0, action_bias=0.0):
    w1, b1, w2, b2, wm, bm = params
    x = jnp.maximum(state @ w1 + b1, 0.0)
    x = jnp.maximum(x @ w2 + b2, 0.0)
    return jnp.tanh(x @ wm + bm) * jnp.asarray(action_scale, jnp.float32) \
        + jnp.asarray(action_bias, jnp.float32)


if __name__ == "__main__":
    B, num_inputs, hidden_dim, num_actions = 2, 16, 32, 4

    key = jax.random.PRNGKey(0)
    k_state, k_params = jax.random.split(key)
    state = jax.random.normal(k_state, (B, num_inputs), jnp.float32)
    params = init_params(k_params, num_inputs, num_actions, hidden_dim)

    # Per-action-dimension scale/bias (as PyTorch builds from action_space).
    high = jnp.array([1.0, 2.0, 0.5, 3.0], jnp.float32)
    low = jnp.array([-1.0, -2.0, -0.5, -1.0], jnp.float32)
    action_scale = (high - low) / 2.0
    action_bias = (high + low) / 2.0

    ref = reference_forward(state, params, action_scale, action_bias)

    # Exact-semantics path (f32 matmuls): tight tolerance.
    prep_f32 = prepare_policy_params(params, action_scale, action_bias,
                                     use_bf16=False)
    mean_f32 = jax.block_until_ready(
        deterministic_policy_forward(state, prep_f32))
    assert mean_f32.shape == (B, num_actions)
    assert jnp.allclose(mean_f32, ref, atol=1e-5, rtol=1e-5), (mean_f32, ref)

    # Performance path (bf16 MXU inputs, f32 accumulation): bf16 tolerance.
    prep_bf16 = prepare_policy_params(params, action_scale, action_bias,
                                      use_bf16=True)
    mean_bf16 = jax.block_until_ready(
        deterministic_policy_forward(state, prep_bf16))
    assert mean_bf16.shape == (B, num_actions)
    assert jnp.allclose(mean_bf16, ref, atol=3e-2, rtol=3e-2), (mean_bf16, ref)

    # Scalar scale/bias path (action_space=None in the PyTorch module).
    ref_s = reference_forward(state, params, 1.0, 0.0)
    prep_s = prepare_policy_params(params, 1.0, 0.0, use_bf16=False)
    mean_s = jax.block_until_ready(deterministic_policy_forward(state, prep_s))
    assert jnp.allclose(mean_s, ref_s, atol=1e-5, rtol=1e-5), (mean_s, ref_s)

    print("KERNEL_OK")
</pallas_src>

<mosaic_0001>
module attributes {stable_mosaic.version = 11 : i64} {
  func.func @_policy_kernel(%arg0: i32, %arg1: memref<16x16xf32, #tpu.memory_space<vmem>>, %arg2: memref<16x128xf32, #tpu.memory_space<vmem>>, %arg3: memref<1x128xf32, #tpu.memory_space<vmem>>, %arg4: memref<128x128xf32, #tpu.memory_space<vmem>>, %arg5: memref<1x128xf32, #tpu.memory_space<vmem>>, %arg6: memref<128x4xf32, #tpu.memory_space<vmem>>, %arg7: memref<1x4xf32, #tpu.memory_space<vmem>>, %arg8: memref<1x4xf32, #tpu.memory_space<vmem>>, %arg9: memref<1x4xf32, #tpu.memory_space<vmem>>, %arg10: memref<16x4xf32, #tpu.memory_space<vmem>>) attributes {dimension_semantics = [#tpu.dimension_semantics<parallel>], iteration_bounds = array<i64: 1>, scalar_prefetch = 0 : i64, scratch_operands = 0 : i64, tpu.core_type = #tpu.core_type<tc>, window_params = [{transform_indices = @transform_0, window_bounds = array<i64: 16, 16>}, {pipeline_mode = #tpu.pipeline_mode<synchronous>, transform_indices = @transform_1, window_bounds = array<i64: 16, 128>}, {pipeline_mode = #tpu.pipeline_mode<synchronous>, transform_indices = @transform_2, window_bounds = array<i64: 1, 128>}, {pipeline_mode = #tpu.pipeline_mode<synchronous>, transform_indices = @transform_3, window_bounds = array<i64: 128, 128>}, {pipeline_mode = #tpu.pipeline_mode<synchronous>, transform_indices = @transform_4, window_bounds = array<i64: 1, 128>}, {pipeline_mode = #tpu.pipeline_mode<synchronous>, transform_indices = @transform_5, window_bounds = array<i64: 128, 4>}, {pipeline_mode = #tpu.pipeline_mode<synchronous>, transform_indices = @transform_6, window_bounds = array<i64: 1, 4>}, {pipeline_mode = #tpu.pipeline_mode<synchronous>, transform_indices = @transform_7, window_bounds = array<i64: 1, 4>}, {pipeline_mode = #tpu.pipeline_mode<synchronous>, transform_indices = @transform_8, window_bounds = array<i64: 1, 4>}, {transform_indices = @transform_9, window_bounds = array<i64: 16, 4>}]} {
    %c0 = arith.constant 0 : index
    %c0_0 = arith.constant 0 : index
    %0 = vector.load %arg1[%c0, %c0_0] : memref<16x16xf32, #tpu.memory_space<vmem>>, vector<16x16xf32>
    %c0_1 = arith.constant 0 : index
    %c0_2 = arith.constant 0 : index
    %1 = vector.load %arg2[%c0_1, %c0_2] : memref<16x128xf32, #tpu.memory_space<vmem>>, vector<16x128xf32>
    %cst = arith.constant dense<0.000000e+00> : vector<16x128xf32>
    %2 = tpu.matmul %0, %1, %cst {dimension_numbers = #tpu.dot_dimension_numbers<[1], [0], [0], [1], [0, 0, 1, 1], [], []>} : vector<16x16xf32>, vector<16x128xf32>, vector<16x128xf32> -> vector<16x128xf32>
    %c0_3 = arith.constant 0 : index
    %c0_4 = arith.constant 0 : index
    %3 = vector.load %arg3[%c0_3, %c0_4] : memref<1x128xf32, #tpu.memory_space<vmem>>, vector<1x128xf32>
    %4 = vector.broadcast %3 : vector<1x128xf32> to vector<16x128xf32>
    %5 = arith.addf %2, %4 : vector<16x128xf32>
    %cst_5 = arith.constant 0.000000e+00 : f32
    %6 = vector.broadcast %cst_5 : f32 to vector<16x128xf32>
    %7 = arith.maximumf %5, %6 : vector<16x128xf32>
    %c0_6 = arith.constant 0 : index
    %c0_7 = arith.constant 0 : index
    %8 = vector.load %arg4[%c0_6, %c0_7] : memref<128x128xf32, #tpu.memory_space<vmem>>, vector<128x128xf32>
    %cst_8 = arith.constant dense<0.000000e+00> : vector<16x128xf32>
    %9 = tpu.matmul %7, %8, %cst_8 {dimension_numbers = #tpu.dot_dimension_numbers<[1], [0], [0], [1], [0, 0, 1, 1], [], []>} : vector<16x128xf32>, vector<128x128xf32>, vector<16x128xf32> -> vector<16x128xf32>
    %c0_9 = arith.constant 0 : index
    %c0_10 = arith.constant 0 : index
    %10 = vector.load %arg5[%c0_9, %c0_10] : memref<1x128xf32, #tpu.memory_space<vmem>>, vector<1x128xf32>
    %11 = vector.broadcast %10 : vector<1x128xf32> to vector<16x128xf32>
    %12 = arith.addf %9, %11 : vector<16x128xf32>
    %cst_11 = arith.constant 0.000000e+00 : f32
    %13 = vector.broadcast %cst_11 : f32 to vector<16x128xf32>
    %14 = arith.maximumf %12, %13 : vector<16x128xf32>
    %c0_12 = arith.constant 0 : index
    %c0_13 = arith.constant 0 : index
    %15 = vector.load %arg6[%c0_12, %c0_13] : memref<128x4xf32, #tpu.memory_space<vmem>>, vector<128x4xf32>
    %cst_14 = arith.constant dense<0.000000e+00> : vector<16x4xf32>
    %16 = tpu.matmul %14, %15, %cst_14 {dimension_numbers = #tpu.dot_dimension_numbers<[1], [0], [0], [1], [0, 0, 1, 1], [], []>} : vector<16x128xf32>, vector<128x4xf32>, vector<16x4xf32> -> vector<16x4xf32>
    %c0_15 = arith.constant 0 : index
    %c0_16 = arith.constant 0 : index
    %17 = vector.load %arg7[%c0_15, %c0_16] : memref<1x4xf32, #tpu.memory_space<vmem>>, vector<1x4xf32>
    %18 = vector.broadcast %17 : vector<1x4xf32> to vector<16x4xf32>
    %19 = arith.addf %16, %18 : vector<16x4xf32>
    %20 = math.tanh %19 : vector<16x4xf32>
    %c0_17 = arith.constant 0 : index
    %c0_18 = arith.constant 0 : index
    %21 = vector.load %arg8[%c0_17, %c0_18] : memref<1x4xf32, #tpu.memory_space<vmem>>, vector<1x4xf32>
    %22 = vector.broadcast %21 : vector<1x4xf32> to vector<16x4xf32>
    %23 = arith.mulf %20, %22 : vector<16x4xf32>
    %c0_19 = arith.constant 0 : index
    %c0_20 = arith.constant 0 : index
    %24 = vector.load %arg9[%c0_19, %c0_20] : memref<1x4xf32, #tpu.memory_space<vmem>>, vector<1x4xf32>
    %25 = vector.broadcast %24 : vector<1x4xf32> to vector<16x4xf32>
    %26 = arith.addf %23, %25 : vector<16x4xf32>
    %c0_21 = arith.constant 0 : index
    %c0_22 = arith.constant 0 : index
    %27 = vector.load %arg10[%c0_21, %c0_22] : memref<16x4xf32, #tpu.memory_space<vmem>>, vector<16x4xf32>
    tpu.vector_store %arg10[%c0_21, %c0_22], %26 {strides = array<i32>} : memref<16x4xf32, #tpu.memory_space<vmem>>, vector<16x4xf32>,
    return
  }
  func.func @transform_0(%arg0: i32) -> (i32, i32) {
    %c0_i32 = arith.constant 0 : i32
    %c0_i32_0 = arith.constant 0 : i32
    return %arg0, %c0_i32 : i32, i32
  }
  func.func @transform_1(%arg0: i32) -> (i32, i32) {
    %c0_i32 = arith.constant 0 : i32
    %c0_i32_0 = arith.constant 0 : i32
    %c0_i32_1 = arith.constant 0 : i32
    return %c0_i32, %c0_i32_0 : i32, i32
  }
  func.func @transform_2(%arg0: i32) -> (i32, i32) {
    %c0_i32 = arith.constant 0 : i32
    %c0_i32_0 = arith.constant 0 : i32
    %c0_i32_1 = arith.constant 0 : i32
    return %c0_i32, %c0_i32_0 : i32, i32
  }
  func.func @transform_3(%arg0: i32) -> (i32, i32) {
    %c0_i32 = arith.constant 0 : i32
    %c0_i32_0 = arith.constant 0 : i32
    %c0_i32_1 = arith.constant 0 : i32
    return %c0_i32, %c0_i32_0 : i32, i32
  }
  func.func @transform_4(%arg0: i32) -> (i32, i32) {
    %c0_i32 = arith.constant 0 : i32
    %c0_i32_0 = arith.constant 0 : i32
    %c0_i32_1 = arith.constant 0 : i32
    return %c0_i32, %c0_i32_0 : i32, i32
  }
  func.func @transform_5(%arg0: i32) -> (i32, i32) {
    %c0_i32 = arith.constant 0 : i32
    %c0_i32_0 = arith.constant 0 : i32
    %c0_i32_1 = arith.constant 0 : i32
    return %c0_i32, %c0_i32_0 : i32, i32
  }
  func.func @transform_6(%arg0: i32) -> (i32, i32) {
    %c0_i32 = arith.constant 0 : i32
    %c0_i32_0 = arith.constant 0 : i32
    %c0_i32_1 = arith.constant 0 : i32
    return %c0_i32, %c0_i32_0 : i32, i32
  }
  func.func @transform_7(%arg0: i32) -> (i32, i32) {
    %c0_i32 = arith.constant 0 : i32
    %c0_i32_0 = arith.constant 0 : i32
    %c0_i32_1 = arith.constant 0 : i32
    return %c0_i32, %c0_i32_0 : i32, i32
  }
  func.func @transform_8(%arg0: i32) -> (i32, i32) {
    %c0_i32 = arith.constant 0 : i32
    %c0_i32_0 = arith.constant 0 : i32
    %c0_i32_1 = arith.constant 0 : i32
    return %c0_i32, %c0_i32_0 : i32, i32
  }
  func.func @transform_9(%arg0: i32) -> (i32, i32) {
    %c0_i32 = arith.constant 0 : i32
    %c0_i32_0 = arith.constant 0 : i32
    return %arg0, %c0_i32 : i32, i32
  }
}

</mosaic_0001>

<bundles_post_ra>
// kernel: tpu_custom_call.1
= control target key start
LH: loop header
LB: loop body
LE: loop exit
PB: predicated region body
PF: predicated region fallthrough
CT: control target
= control target key end

     0   :  { %14 = vsyncpa [#allocation3], 0  ;;  %s829_s0 = inlined_call_operand.vmem [shape: f32[2,16], index: 0, kind: input, shape index: {}]   ;;  %s830_s1 = inlined_call_operand.hbm [shape: f32[16,128], index: 1, kind: input, shape index: {}]   ;;  %s831_s2 = inlined_call_operand.vmem [shape: f32[1,128], index: 2, kind: input, shape index: {}]   ;;  %s832_s3 = inlined_call_operand.vmem [shape: f32[128,128], index: 3, kind: input, shape index: {}]   ;;  %s833_s4 = inlined_call_operand.vmem [shape: f32[1,128], index: 4, kind: input, shape index: {}]   ;;  %s834_s5 = inlined_call_operand.vmem [shape: f32[128,4], index: 5, kind: input, shape index: {}]   ;;  %s835_s6 = inlined_call_operand.vmem [shape: f32[1,4], index: 6, kind: input, shape index: {}]   ;;  %s836_s7 = inlined_call_operand.vmem [shape: f32[1,4], index: 7, kind: input, shape index: {}]   ;;  %s837_s8 = inlined_call_operand.vmem [shape: f32[1,4], index: 8, kind: input, shape index: {}]   ;;  %s838_s9 = inlined_call_operand.hbm [shape: f32[2,4], index: 9, kind: output, shape index: {}]  }
   0x1   :  { %15 = vsyncpa [#allocation4], 0  ;;  %s630_s30 = smov [#allocation2]   ;;  %s582_s13 = scalar_lea.hbm %s830_s1, 256 }
   0x2   :  { %s23_s10 = sshll.u32 %s630_s30, 4  ;;  %p583_p0 = scmp.ne.s32.totalorder %s830_s1, %s582_s13  ;;  %s24_s10 = int_to_ptr.vmem [resolvable:$true] %s23_s10 }
   0x3   :  { %p586_p1 = scmp.lt.u32.totalorder %s582_s13, %s830_s1 }
   0x5   :  { %p588_p2 = pnand %p586_p1, %p583_p0 }
   0x7   :  { %591 = shalt.err (!%p588_p2)
}
   0x8   :  { %s592_s18 = scalar_lea.vmem %s24_s10, 256  ;;  %p597_p4 = scmp.lt.s32.totalorder %s24_s10, %s24_s10 }
   0x9   :  { %p593_p3 = scmp.ne.s32.totalorder %s24_s10, %s592_s18  ;;  %p598_p5 = scmp.lt.s32.totalorder %s592_s18, %s592_s18 }
   0xb   :  { %p599_p6 = por %p598_p5, %p597_p4 }
   0xd   :  { %p600_p7 = pnand %p599_p6, %p593_p3 }
   0xf   :  { %603 = shalt.err (!%p600_p7)
}
  0x10   :  { %s631_s19 = smov 128   ;;  %s632_s20 = smov 8  }
  0x11   :  { %29 = dma.hbm_to_vmem [thread:$0]  %s830_s1, 256, %s24_s10, [#allocation3], %s631_s19, %s631_s19, %s632_s20  }
  0x12   :  { %626 = dma.done.wait [#allocation3], 256  }
  0x13   :  { %627 = vsyncadd [#allocation3], 4294967040  ;;  %vm58_vm0 = vcmask 130048   ;;  %v49_v0 = vld [vmem:[#allocation2] sm:$0xff]  ;;  %v50_v1 = vld [vmem:[#allocation2 + $0x8] sm:$0xff]  ;;  %vm360_vm1 = vcmask 31744  }
  0x14   :  { %v47_v2 = vld [vmem:[%s829_s0] sm:$0xff]  ;;  %v504_v3 = vpack.c.bf16 %v50_v1, %v49_v0  ;;  %v143_v5 = vld [vmem:[%s832_s3 + $0x8] sm:$0xff]  ;;  %v144_v7 = vld [vmem:[%s832_s3 + $0x10] sm:$0xff] }
  0x15   :  { %431 = vmatprep.mubr.msk.f32.mxu0 %vm58_vm0, %v47_v2  ;;  %v142_v4 = vld [vmem:[%s832_s3] sm:$0xff]  ;;  %v145_v8 = vld [vmem:[%s832_s3 + $0x18] sm:$0xff]  ;;  %v147_v11 = vld [vmem:[%s832_s3 + $0x28] sm:$0xff] }
  0x16   :  { %v508_v6 = vpack.c.bf16 %v143_v5, %v142_v4  ;;  %505 = vmatprep.subr.bf16.mxu0 %v504_v3  ;;  %v512_v9 = vpack.c.bf16 %v145_v8, %v144_v7  ;;  %v146_v10 = vld [vmem:[%s832_s3 + $0x20] sm:$0xff]  ;;  %v48_v12 = vld [vmem:[%s829_s0 + $0x8] sm:$0xff]  ;;  %v148_v14 = vld [vmem:[%s832_s3 + $0x30] sm:$0xff] }
  0x17   :  { %507 = vmatpush3.bf16.msra.mxu0 %v504_v3  ;;  %v516_v13 = vpack.c.bf16 %v147_v11, %v146_v10  ;;  %v149_v15 = vld [vmem:[%s832_s3 + $0x38] sm:$0xff]  ;;  %v150_v17 = vld [vmem:[%s832_s3 + $0x40] sm:$0xff]  ;;  %v151_v18 = vld [vmem:[%s832_s3 + $0x48] sm:$0xff] }
  0x18   :  { %509 = vmatprep.subr.bf16.mxu1 %v508_v6  ;;  %v520_v16 = vpack.c.bf16 %v149_v15, %v148_v14  ;;  %v524_v19 = vpack.c.bf16 %v151_v18, %v150_v17  ;;  %v152_v20 = vld [vmem:[%s832_s3 + $0x50] sm:$0xff]  ;;  %v153_v21 = vld [vmem:[%s832_s3 + $0x58] sm:$0xff]  ;;  %v154_v23 = vld [vmem:[%s832_s3 + $0x60] sm:$0xff] }
  0x19   :  { %511 = vmatpush3.bf16.msra.mxu1 %v508_v6  ;;  %v528_v22 = vpack.c.bf16 %v153_v21, %v152_v20  ;;  %v155_v24 = vld [vmem:[%s832_s3 + $0x68] sm:$0xff]  ;;  %v156_v26 = vld [vmem:[%s832_s3 + $0x70] sm:$0xff]  ;;  %v157_v27 = vld [vmem:[%s832_s3 + $0x78] sm:$0xff] }
  0x1a   :  { %513 = vmatprep.subr.bf16.mxu1 %v512_v9  ;;  %432 = vmatmul.mubr.msk.f32.vlgmr.msra.gmra.mrb[0].mxu0 %vm58_vm0, %v48_v12  ;;  %v532_v25 = vpack.c.bf16 %v155_v24, %v154_v23  ;;  %v536_v28 = vpack.c.bf16 %v157_v27, %v156_v26  ;;  %v242_v29 = vld [vmem:[%s834_s5] sm:$0xff]  ;;  %v243_v30 = vld [vmem:[%s834_s5 + $0x8] sm:$0xff]  ;;  %v244_v31 = vld [vmem:[%s834_s5 + $0x10] sm:$0xff] }
  0x1b   :  { %v540_v32 = vpack.c.bf16 %v243_v30, %v242_v29  ;;  %v245_v33 = vld [vmem:[%s834_s5 + $0x18] sm:$0xff]  ;;  %v246_v35 = vld [vmem:[%s834_s5 + $0x20] sm:$0xff]  ;;  %v247_v36 = vld [vmem:[%s834_s5 + $0x28] sm:$0xff] }
  0x1c   :  { %v544_v34 = vpack.c.bf16 %v245_v33, %v244_v31  ;;  %v548_v37 = vpack.c.bf16 %v247_v36, %v246_v35  ;;  %v248_v38 = vld [vmem:[%s834_s5 + $0x30] sm:$0xff]  ;;  %v249_v39 = vld [vmem:[%s834_s5 + $0x38] sm:$0xff]  ;;  %v250_v41 = vld [vmem:[%s834_s5 + $0x40] sm:$0xff] }
  0x1d   :  { %515 = vmatpush3.bf16.msra.mxu1 %v512_v9  ;;  %541 = vmatprep.subr.bf16.mxu0 %v540_v32  ;;  %v552_v40 = vpack.c.bf16 %v249_v39, %v248_v38  ;;  %v251_v42 = vld [vmem:[%s834_s5 + $0x48] sm:$0xff]  ;;  %v252_v44 = vld [vmem:[%s834_s5 + $0x50] sm:$0xff]  ;;  %v253_v45 = vld [vmem:[%s834_s5 + $0x58] sm:$0xff] }
  0x1e   :  { %517 = vmatprep.subr.bf16.mxu1 %v516_v13  ;;  %543 = vmatpush3.bf16.msra.mxu0 %v540_v32  ;;  %v556_v43 = vpack.c.bf16 %v251_v42, %v250_v41  ;;  %v560_v46 = vpack.c.bf16 %v253_v45, %v252_v44  ;;  %v254_v47 = vld [vmem:[%s834_s5 + $0x60] sm:$0xff]  ;;  %v255_v48 = vld [vmem:[%s834_s5 + $0x68] sm:$0xff]  ;;  %v256_v57 = vld [vmem:[%s834_s5 + $0x70] sm:$0xff] }
  0x1f   :  { %545 = vmatprep.subr.bf16.mxu0 %v544_v34  ;;  %v564_v49 = vpack.c.bf16 %v255_v48, %v254_v47  ;;  %v380_v50 = vld [vmem:[%s831_s2] ss:$0 sm:$0xff]  ;;  %v257_v58 = vld [vmem:[%s834_s5 + $0x78] sm:$0xff] }
  0x20   :  { %v568_v59 = vpack.c.bf16 %v257_v58, %v256_v57  ;;  %v383_v60 = vld [vmem:[%s833_s4] ss:$0 sm:$0xff] }
  0x21   :  { %519 = vmatpush3.bf16.msra.mxu1 %v516_v13  ;;  %v384_v3 = vld [vmem:[%s835_s6] ss:$0 sm:$0xff] }
  0x22   :  { %521 = vmatprep.subr.bf16.mxu1 %v520_v16  ;;  %547 = vmatpush3.bf16.msra.mxu0 %v544_v34  ;;  %v385_v8 = vld [vmem:[%s836_s7] ss:$0 sm:$0xff] }
  0x23   :  { %549 = vmatprep.subr.bf16.mxu0 %v548_v37  ;;  %v386_v10 = vld [vmem:[%s837_s8] ss:$0 sm:$0xff] }
  0x25   :  { %523 = vmatpush3.bf16.msra.mxu1 %v520_v16 }
  0x26   :  { %525 = vmatprep.subr.bf16.mxu1 %v524_v19  ;;  %551 = vmatpush3.bf16.msra.mxu0 %v548_v37 }
  0x27   :  { %553 = vmatprep.subr.bf16.mxu0 %v552_v40 }
  0x29   :  { %527 = vmatpush3.bf16.msra.mxu1 %v524_v19 }
  0x2a   :  { %529 = vmatprep.subr.bf16.mxu1 %v528_v22  ;;  %555 = vmatpush3.bf16.msra.mxu0 %v552_v40 }
  0x2b   :  { %557 = vmatprep.subr.bf16.mxu0 %v556_v43 }
  0x2d   :  { %531 = vmatpush3.bf16.msra.mxu1 %v528_v22 }
  0x2e   :  { %533 = vmatprep.subr.bf16.mxu1 %v532_v25  ;;  %559 = vmatpush3.bf16.msra.mxu0 %v556_v43 }
  0x2f   :  { %561 = vmatprep.subr.bf16.mxu0 %v560_v46 }
  0x31   :  { %535 = vmatpush3.bf16.msra.mxu1 %v532_v25 }
  0x32   :  { %537 = vmatprep.subr.bf16.mxu1 %v536_v28  ;;  %563 = vmatpush3.bf16.msra.mxu0 %v560_v46 }
  0x33   :  { %565 = vmatprep.subr.bf16.mxu0 %v564_v49 }
  0x35   :  { %539 = vmatpush3.bf16.msra.mxu1 %v536_v28 }
  0x36   :  { %567 = vmatpush3.bf16.msra.mxu0 %v564_v49 }
  0x37   :  { %569 = vmatprep.subr.bf16.mxu0 %v568_v59 }
  0x3a   :  { %571 = vmatpush3.bf16.msra.mxu0 %v568_v59 }
  0xed   :  { %v433_v51 = vpop.f32.mrb[0].mxu0 }
  0xee   :  { %v137_v52 = vadd.f32 %v433_v51, %v380_v50  ;;  %v131_v53 = vpop.f32.mrb[1].mxu0 }
  0xef   :  { %v132_v54 = vadd.f32 %v380_v50, %v131_v53 }
  0xf0   :  { %v141_v56 = vmax.f32 %v137_v52, 0.0 }
  0xf1   :  { %v140_v55 = vmax.f32 %v132_v54, 0.0 }
  0xf3   :  { %466 = vmatprep.mubr.f32.mxu1 %v140_v55 }
  0xf4   :  { %467 = vmatmul.mubr.f32.vlgmr.msra.gmra.mrb[0].mxu1 %v141_v56 }
 0x1c7   :  { %v468_v61 = vpop.f32.mrb[0].mxu1 }
 0x1c8   :  { %v237_v62 = vadd.f32 %v468_v61, %v383_v60  ;;  %v231_v63 = vpop.f32.mrb[1].mxu1 }
 0x1c9   :  { %v232_v0 = vadd.f32 %v383_v60, %v231_v63 }
 0x1ca   :  { %v241_v2 = vmax.f32 %v237_v62, 0.0 }
 0x1cb   :  { %v240_v1 = vmax.f32 %v232_v0, 0.0 }
 0x1cd   :  { %501 = vmatprep.mubr.f32.mxu0 %v240_v1 }
 0x1ce   :  { %502 = vmatmul.mubr.f32.vlgmr.msra.gmra.mrb[2].mxu0 %v241_v2 }
 0x2a1   :  { %v503_v4 = vpop.f32.mrb[2].mxu0 }
 0x2a2   :  { %v337_v5 = vadd.f32 %v503_v4, %v384_v3  ;;  %v331_v6 = vpop.f32.mrb[3].mxu0 }
 0x2a3   :  { %v332_v7 = vadd.f32 %v384_v3, %v331_v6 }
 0x2a4   :  { %578 = vtanh.f32 %v337_v5 }
 0x2a5   :  { %580 = vtanh.f32 %v332_v7 }
 0x2ae   :  { %v579_v9 = vpop.eup %578 }
 0x2af   :  { %v581_v11 = vpop.eup %580  ;;  %v350_v12 = vmul.f32 %v579_v9, %v385_v8 }
 0x2b0   :  { %v349_v13 = vmul.f32 %v581_v11, %v385_v8 }
 0x2b1   :  { %v359_v14 = vadd.f32 %v386_v10, %v350_v12 }
 0x2b2   :  { %v358_v15 = vadd.f32 %v386_v10, %v349_v13 }
 0x2b3   :  { %362 = vst.msk [vmem:[#allocation5 + $0x8] sm:$0xff] %vm360_vm1, %v359_v14 }
 0x2b4   :  { %361 = vst.msk [vmem:[#allocation5] sm:$0xff] %vm360_vm1, %v358_v15 }
 0x2b5   :  { %367 = vsyncadd [#allocation4], 224  ;;  %s633_s6 = smov [#allocation5]  }
 0x2b6   :  { %s368_s27 = sshll.u32 %s633_s6, 4  ;;  %s369_s27 = int_to_ptr.vmem [resolvable:$true] %s368_s27 }
 0x2b7   :  { %s604_s28 = scalar_lea.vmem %s369_s27, 32  ;;  %s608_s7 = scalar_lea.vmem %s369_s27, 256 }
 0x2b8   :  { %p605_p8 = scmp.ne.s32.totalorder %s369_s27, %s604_s28  ;;  %p609_p9 = scmp.lt.s32.totalorder %s369_s27, %s369_s27 }
 0x2b9   :  { %p610_p10 = scmp.lt.s32.totalorder %s608_s7, %s604_s28 }
 0x2bb   :  { %p611_p11 = por %p610_p10, %p609_p9 }
 0x2bd   :  { %p612_p12 = pnand %p611_p11, %p605_p8 }
 0x2bf   :  { %615 = shalt.err (!%p612_p12)
}
 0x2c0   :  { %s616_s29 = scalar_lea.hbm %s838_s9, 32 }
 0x2c1   :  { %p617_p13 = scmp.ne.s32.totalorder %s838_s9, %s616_s29  ;;  %p620_p0 = scmp.lt.u32.totalorder %s616_s29, %s838_s9 }
 0x2c3   :  { %p622_p1 = pnand %p620_p0, %p617_p13 }
 0x2c5   :  { %625 = shalt.err (!%p622_p1)
}
 0x2c6   :  { %s634_s13 = smov 32   ;;  %s635_s14 = smov 2  }
 0x2c7   :  { %374 = dma.vmem_to_hbm [thread:$0]  %s369_s27, 32, %s838_s9, [#allocation4], %s634_s13, %s634_s13, %s635_s14  }
 0x2c8   :  { %628 = dma.done.wait [#allocation4], 256  }
 0x2c9   :  { %629 = vsyncadd [#allocation4], 4294967040 }
 0x2ca   :  { %378 = vsyncpa [#allocation3], 1 }
 0x2cb   :  { %379 = vsyncpa [#allocation4], 1 }

</bundles_post_ra>
